<compile_context>
chip_gen: v5e
topology: v5e:2x2
jax: 0.10.0
libtpu: 0.0.40
codegen_flags: <defaults>
</compile_context>

<pallas_src>
import jax
import jax.numpy as jnp
import numpy as np
from jax.experimental import pallas as pl
from jax.experimental.pallas import tpu as pltpu

_LANE = 128


def _gru_unit_kernel(adj_ref, x_ref, mask_ref, wg_ref, bg_ref, wh1_ref,
                     out_ref):
    m, g = x_ref.shape              # m = tb*N, g = lane-padded feature dim
    tb, n, _ = adj_ref.shape

    x2 = x_ref[...]                 # (M, G) f32, lanes >= D are exact zeros
    x2_bf = x2.astype(jnp.bfloat16)
    mask2 = mask_ref[...]           # (M, 1) f32

    # Message aggregation a = adj @ x (batched over tb).  The (M,G)<->(tb,N,G)
    # reshapes only split/merge the leading axis, so they are layout-free
    # (N is a multiple of the 8-row sublane tile at these shapes).
    adj = adj_ref[...]              # (tb, N, N) bf16
    a = jnp.einsum('bnm,bmd->bnd', adj, x2_bf.reshape(tb, n, g),
                   preferred_element_type=jnp.float32)            # (tb,N,G) f32
    a2_bf = a.reshape(m, g).astype(jnp.bfloat16)                  # (M, G)

    # Single fused gate matmul:  [a | x] @ [[Wz0|Wr0|Wh0],[Wz1|Wr1|0]].
    # Both concat pieces are full 128-lane groups -> no lane shifting.
    ax = jnp.concatenate([a2_bf, x2_bf], axis=1)                  # (M, 2G) bf16
    gates = jnp.dot(ax, wg_ref[...],
                    preferred_element_type=jnp.float32) + bg_ref[...]  # (M,3G)

    # Each gate occupies its own 128-lane-aligned column group -> aligned
    # full-vreg slices (no cross-lane rotations).
    z = jax.nn.sigmoid(gates[:, 0:g])
    r = jax.nn.sigmoid(gates[:, g:2 * g])
    hpre = gates[:, 2 * g:3 * g]

    # Only the (r*x) @ Wh1 dot cannot be fused.
    h1 = jnp.dot((r * x2).astype(jnp.bfloat16), wh1_ref[...],
                 preferred_element_type=jnp.float32)              # (M, G)
    h = jnp.tanh(mask2 * (hpre + h1))                             # act = tanh

    # x + z*(h - x) == h*z + x*(1-z); padded lanes stay exactly 0.
    out_ref[...] = (x2 + z * (h - x2)).astype(out_ref.dtype)      # lane-dense


def _pick_batch_block(B, N, G, *, vmem_budget_bytes=16 << 20):
    """Largest divisor of B that (a) keeps >= 2 grid steps when B >= 2 (v7x has
    two TensorCores), (b) fits double-buffered blocks in the VMEM budget
    (sized for v7x's 64 MiB physical / 32 MiB scoped default), and (c) stops
    growing once the flattened MXU M dim (tb*N) reaches ~512 rows — beyond
    that extra grid steps buy DMA/compute overlap instead."""
    def step_bytes(tb):
        adj_b = tb * N * N * 2            # bf16 adj block
        x_b = tb * N * G * 4              # f32 x block (lane-padded)
        m_b = tb * N * 4                  # f32 mask block
        o_b = tb * N * G * 4              # f32 out block
        return 2 * (adj_b + x_b + m_b + o_b)   # double-buffered
    best = 1
    for t in range(1, B + 1):
        if B % t:
            continue
        if B >= 2 and B // t < 2:
            continue                      # keep >= 2 parallel steps (v7x)
        if step_bytes(t) > vmem_budget_bytes:
            continue
        if best * N >= 512:
            break                         # MXU M already filled; prefer steps
        best = t
    return best


def gru_unit_forward(adj, x, mask, params, *, batch_block=None,
                     vmem_budget_bytes=16 << 20):
    """adj: (B,N,N), x: (B,N,D), mask: (B,N,1). Returns (B,N,D)."""
    B, N, D = x.shape
    (wz0, wz1, wr0, wr1, wh0, wh1,
     bz0, bz1, br0, br1, bh0, bh1) = params

    # Lane-pad the feature dim so gate column groups, the epilogue and the
    # output slab are full 128-lane groups.  Padded lanes carry exact zeros.
    G = ((D + _LANE - 1) // _LANE) * _LANE

    tb = (_pick_batch_block(B, N, G, vmem_budget_bytes=vmem_budget_bytes)
          if batch_block is None else batch_block)
    assert B % tb == 0, "batch_block must divide B"
    nb = B // tb
    M = B * N

    def pad_cols(w):   # (..., <=G) -> (..., G)
        return jnp.pad(w, ((0, 0), (0, G - w.shape[-1])))

    def pad_rows(w):   # (<=G, ...) -> (G, ...)
        return jnp.pad(w, ((0, G - w.shape[0]), (0, 0)))

    # Fused, lane-aligned gate weight and biases (built once, outside the grid).
    def gate_block(w_a, w_x):                    # -> (2G, G)
        return pad_cols(jnp.concatenate([pad_rows(w_a), pad_rows(w_x)], axis=0))

    w_gates = jnp.concatenate(
        [gate_block(wz0, wz1), gate_block(wr0, wr1),
         gate_block(wh0, jnp.zeros_like(wh0))], axis=1).astype(jnp.bfloat16)

    def gate_bias(b_a, b_x):                     # -> (1, G)
        return pad_cols((b_a + b_x).reshape(1, D))

    b_gates = jnp.concatenate(
        [gate_bias(bz0, bz1), gate_bias(br0, br1), gate_bias(bh0, bh1)],
        axis=1).astype(jnp.float32)              # (1, 3G)

    wh1_pad = pad_cols(pad_rows(wh1)).astype(jnp.bfloat16)        # (G, G)

    adj_bf = adj.astype(jnp.bfloat16)            # dominant HBM stream, halved
    x_pad = pad_cols(x.reshape(M, D)).astype(jnp.float32)         # (M, G)
    mask2 = mask.reshape(M, 1).astype(jnp.float32)                # (M, 1)

    in_specs = [
        pl.BlockSpec((tb, N, N), lambda b: (b, 0, 0)),   # adj (bf16)
        pl.BlockSpec((tb * N, G), lambda b: (b, 0)),     # x (f32, lane-padded)
        pl.BlockSpec((tb * N, 1), lambda b: (b, 0)),     # mask (f32)
        pl.BlockSpec((2 * G, 3 * G), lambda b: (0, 0)),  # fused gate weights
        pl.BlockSpec((1, 3 * G), lambda b: (0, 0)),      # fused gate biases
        pl.BlockSpec((G, G), lambda b: (0, 0)),          # Wh1
        # NOTE: pipeline_mode=pl.Buffered(3) on the adj spec is a further knob
        # if the adj DMA is exposed; left at the default double-buffering.
    ]
    out_spec = pl.BlockSpec((tb * N, G), lambda b: (b, 0))   # lane-dense slab

    cost = pl.CostEstimate(
        flops=(2 * B * N * N * G            # adj @ x
               + 2 * M * (2 * G) * (3 * G)  # fused gate matmul
               + 2 * M * G * G),            # (r*x) @ Wh1
        transcendentals=3 * M * G,          # 2 sigmoids + 1 tanh
        bytes_accessed=(adj_bf.size * 2 + x_pad.size * 4 + mask2.size * 4
                        + M * G * 4 + w_gates.size * 2 + wh1_pad.size * 2
                        + b_gates.size * 4))

    out_pad = pl.pallas_call(
        _gru_unit_kernel,
        out_shape=jax.ShapeDtypeStruct((M, G), x.dtype),
        grid_spec=pltpu.PrefetchScalarGridSpec(
            num_scalar_prefetch=0,
            grid=(nb,),
            in_specs=in_specs,
            out_specs=out_spec,
        ),
        compiler_params=pltpu.CompilerParams(
            dimension_semantics=("parallel",),
            # Above v5e's 16 MiB scoped default; blocks are budgeted to
            # <= ~16 MiB so this also fits v7x's 64 MiB physical VMEM.
            vmem_limit_bytes=32 * 1024 * 1024,
        ),
        cost_estimate=cost,
    )(adj_bf, x_pad, mask2, w_gates, b_gates, wh1_pad)

    # Drop the zero lane-padding and restore (B, N, D) — cheap XLA layout ops.
    return out_pad[:, :D].reshape(B, N, D)


def _glorot(key, fan_in, fan_out):
    limit = jnp.sqrt(6.0 / (fan_in + fan_out))
    return jax.random.uniform(key, (fan_in, fan_out),
                              minval=-limit, maxval=limit, dtype=jnp.float32)


def _uniform_bias(key, dim):
    limit = 1.0 / jnp.sqrt(dim)
    return jax.random.uniform(key, (dim,),
                              minval=-limit, maxval=limit, dtype=jnp.float32)


def _reference(adj, x, mask, params):
    # Pure-f32 reference matching the PyTorch module (eval mode).
    (wz0, wz1, wr0, wr1, wh0, wh1,
     bz0, bz1, br0, br1, bh0, bh1) = params
    a = jnp.matmul(adj, x)
    z = jax.nn.sigmoid(a @ wz0 + bz0 + x @ wz1 + bz1)
    r = jax.nn.sigmoid(a @ wr0 + br0 + x @ wr1 + br1)
    h = jnp.tanh(mask * (a @ wh0 + bh0 + (r * x) @ wh1 + bh1))
    return h * z + x * (1.0 - z)


if __name__ == "__main__":
    B, N, D = 2, 16, 32
    key = jax.random.PRNGKey(0)
    keys = jax.random.split(key, 16)

    adj = jax.random.uniform(keys[0], (B, N, N), dtype=jnp.float32)
    x = jax.random.normal(keys[1], (B, N, D), dtype=jnp.float32)
    mask = (jax.random.uniform(keys[2], (B, N, 1)) > 0.2).astype(jnp.float32)

    params = (
        _glorot(keys[3], D, D), _glorot(keys[4], D, D),
        _glorot(keys[5], D, D), _glorot(keys[6], D, D),
        _glorot(keys[7], D, D), _glorot(keys[8], D, D),
        _uniform_bias(keys[9], D), _uniform_bias(keys[10], D),
        _uniform_bias(keys[11], D), _uniform_bias(keys[12], D),
        _uniform_bias(keys[13], D), _uniform_bias(keys[14], D),
    )

    out = gru_unit_forward(adj, x, mask, params)
    out = jax.block_until_ready(out)

    ref = _reference(adj, x, mask, params)
    # Looser tolerance because matmul operands are bf16 (f32 accumulation).
    np.testing.assert_allclose(np.asarray(out), np.asarray(ref),
                               rtol=5e-2, atol=5e-2)
    print("KERNEL_OK")
</pallas_src>

<mosaic_0001>
module attributes {stable_mosaic.version = 11 : i64} {
  func.func @_gru_unit_kernel(%arg0: i32, %arg1: memref<1x16x16xbf16, #tpu.memory_space<vmem>>, %arg2: memref<16x128xf32, #tpu.memory_space<vmem>>, %arg3: memref<16x1xf32, #tpu.memory_space<vmem>>, %arg4: memref<256x384xbf16, #tpu.memory_space<vmem>>, %arg5: memref<1x384xf32, #tpu.memory_space<vmem>>, %arg6: memref<128x128xbf16, #tpu.memory_space<vmem>>, %arg7: memref<16x128xf32, #tpu.memory_space<vmem>>) attributes {dimension_semantics = [#tpu.dimension_semantics<parallel>], iteration_bounds = array<i64: 2>, scalar_prefetch = 0 : i64, scratch_operands = 0 : i64, tpu.core_type = #tpu.core_type<tc>, window_params = [{transform_indices = @transform_0, window_bounds = array<i64: 1, 16, 16>}, {transform_indices = @transform_1, window_bounds = array<i64: 16, 128>}, {transform_indices = @transform_2, window_bounds = array<i64: 16, 1>}, {pipeline_mode = #tpu.pipeline_mode<synchronous>, transform_indices = @transform_3, window_bounds = array<i64: 256, 384>}, {pipeline_mode = #tpu.pipeline_mode<synchronous>, transform_indices = @transform_4, window_bounds = array<i64: 1, 384>}, {pipeline_mode = #tpu.pipeline_mode<synchronous>, transform_indices = @transform_5, window_bounds = array<i64: 128, 128>}, {transform_indices = @transform_6, window_bounds = array<i64: 16, 128>}]} {
    %c0 = arith.constant 0 : index
    %c0_0 = arith.constant 0 : index
    %0 = vector.load %arg2[%c0, %c0_0] : memref<16x128xf32, #tpu.memory_space<vmem>>, vector<16x128xf32>
    %1 = arith.truncf %0 : vector<16x128xf32> to vector<16x128xbf16>
    %c0_1 = arith.constant 0 : index
    %c0_2 = arith.constant 0 : index
    %2 = vector.load %arg3[%c0_1, %c0_2] : memref<16x1xf32, #tpu.memory_space<vmem>>, vector<16x1xf32>
    %c0_3 = arith.constant 0 : index
    %c0_4 = arith.constant 0 : index
    %c0_5 = arith.constant 0 : index
    %3 = vector.load %arg1[%c0_3, %c0_4, %c0_5] : memref<1x16x16xbf16, #tpu.memory_space<vmem>>, vector<1x16x16xbf16>
    %4 = vector.shape_cast %1 : vector<16x128xbf16> to vector<1x16x128xbf16>
    "tpu.trace_start"() <{level = 10 : i32, message = "bnm,bmd->bnd"}> : () -> ()
    %cst = arith.constant dense<0.000000e+00> : vector<1x16x128xf32>
    %5 = tpu.matmul %3, %4, %cst {dimension_numbers = #tpu.dot_dimension_numbers<[2], [1], [1], [2], [0, 0, 0, 1, 1, 2], [0], [0]>} : vector<1x16x16xbf16>, vector<1x16x128xbf16>, vector<1x16x128xf32> -> vector<1x16x128xf32>
    "tpu.trace_stop"() : () -> ()
    %6 = vector.shape_cast %5 : vector<1x16x128xf32> to vector<16x128xf32>
    %7 = arith.truncf %6 : vector<16x128xf32> to vector<16x128xbf16>
    %8 = tpu.concatenate %7, %1 in 1 : vector<16x128xbf16>, vector<16x128xbf16> -> vector<16x256xbf16>
    %c0_6 = arith.constant 0 : index
    %c0_7 = arith.constant 0 : index
    %9 = vector.load %arg4[%c0_6, %c0_7] : memref<256x384xbf16, #tpu.memory_space<vmem>>, vector<256x384xbf16>
    %cst_8 = arith.constant dense<0.000000e+00> : vector<16x384xf32>
    %10 = tpu.matmul %8, %9, %cst_8 {dimension_numbers = #tpu.dot_dimension_numbers<[1], [0], [0], [1], [0, 0, 1, 1], [], []>} : vector<16x256xbf16>, vector<256x384xbf16>, vector<16x384xf32> -> vector<16x384xf32>
    %c0_9 = arith.constant 0 : index
    %c0_10 = arith.constant 0 : index
    %11 = vector.load %arg5[%c0_9, %c0_10] : memref<1x384xf32, #tpu.memory_space<vmem>>, vector<1x384xf32>
    %12 = vector.broadcast %11 : vector<1x384xf32> to vector<16x384xf32>
    %13 = arith.addf %10, %12 : vector<16x384xf32>
    %14 = vector.extract_strided_slice %13 {offsets = [0, 0], sizes = [16, 128], strides = [1, 1]} : vector<16x384xf32> to vector<16x128xf32>
    %15 = arith.negf %14 : vector<16x128xf32>
    %16 = math.exp %15 : vector<16x128xf32>
    %cst_11 = arith.constant 1.000000e+00 : f32
    %17 = vector.broadcast %cst_11 : f32 to vector<16x128xf32>
    %18 = arith.addf %17, %16 : vector<16x128xf32>
    %19 = arith.divf %17, %18 : vector<16x128xf32>
    %20 = vector.extract_strided_slice %13 {offsets = [0, 128], sizes = [16, 128], strides = [1, 1]} : vector<16x384xf32> to vector<16x128xf32>
    %21 = arith.negf %20 : vector<16x128xf32>
    %22 = math.exp %21 : vector<16x128xf32>
    %cst_12 = arith.constant 1.000000e+00 : f32
    %23 = vector.broadcast %cst_12 : f32 to vector<16x128xf32>
    %24 = arith.addf %23, %22 : vector<16x128xf32>
    %25 = arith.divf %23, %24 : vector<16x128xf32>
    %26 = vector.extract_strided_slice %13 {offsets = [0, 256], sizes = [16, 128], strides = [1, 1]} : vector<16x384xf32> to vector<16x128xf32>
    %27 = arith.mulf %25, %0 : vector<16x128xf32>
    %28 = arith.truncf %27 : vector<16x128xf32> to vector<16x128xbf16>
    %c0_13 = arith.constant 0 : index
    %c0_14 = arith.constant 0 : index
    %29 = vector.load %arg6[%c0_13, %c0_14] : memref<128x128xbf16, #tpu.memory_space<vmem>>, vector<128x128xbf16>
    %cst_15 = arith.constant dense<0.000000e+00> : vector<16x128xf32>
    %30 = tpu.matmul %28, %29, %cst_15 {dimension_numbers = #tpu.dot_dimension_numbers<[1], [0], [0], [1], [0, 0, 1, 1], [], []>} : vector<16x128xbf16>, vector<128x128xbf16>, vector<16x128xf32> -> vector<16x128xf32>
    %31 = arith.addf %26, %30 : vector<16x128xf32>
    %32 = vector.broadcast %2 : vector<16x1xf32> to vector<16x128xf32>
    %33 = arith.mulf %32, %31 : vector<16x128xf32>
    %34 = math.tanh %33 : vector<16x128xf32>
    %35 = arith.subf %34, %0 : vector<16x128xf32>
    %36 = arith.mulf %19, %35 : vector<16x128xf32>
    %37 = arith.addf %0, %36 : vector<16x128xf32>
    %c0_16 = arith.constant 0 : index
    %c0_17 = arith.constant 0 : index
    %38 = vector.load %arg7[%c0_16, %c0_17] : memref<16x128xf32, #tpu.memory_space<vmem>>, vector<16x128xf32>
    tpu.vector_store %arg7[%c0_16, %c0_17], %37 {strides = array<i32>} : memref<16x128xf32, #tpu.memory_space<vmem>>, vector<16x128xf32>,
    return
  }
  func.func @transform_0(%arg0: i32) -> (i32, i32, i32) {
    %c0_i32 = arith.constant 0 : i32
    %c0_i32_0 = arith.constant 0 : i32
    %c0_i32_1 = arith.constant 0 : i32
    return %arg0, %c0_i32, %c0_i32_0 : i32, i32, i32
  }
  func.func @transform_1(%arg0: i32) -> (i32, i32) {
    %c0_i32 = arith.constant 0 : i32
    %c0_i32_0 = arith.constant 0 : i32
    return %arg0, %c0_i32 : i32, i32
  }
  func.func @transform_2(%arg0: i32) -> (i32, i32) {
    %c0_i32 = arith.constant 0 : i32
    %c0_i32_0 = arith.constant 0 : i32
    return %arg0, %c0_i32 : i32, i32
  }
  func.func @transform_3(%arg0: i32) -> (i32, i32) {
    %c0_i32 = arith.constant 0 : i32
    %c0_i32_0 = arith.constant 0 : i32
    %c0_i32_1 = arith.constant 0 : i32
    return %c0_i32, %c0_i32_0 : i32, i32
  }
  func.func @transform_4(%arg0: i32) -> (i32, i32) {
    %c0_i32 = arith.constant 0 : i32
    %c0_i32_0 = arith.constant 0 : i32
    %c0_i32_1 = arith.constant 0 : i32
    return %c0_i32, %c0_i32_0 : i32, i32
  }
  func.func @transform_5(%arg0: i32) -> (i32, i32) {
    %c0_i32 = arith.constant 0 : i32
    %c0_i32_0 = arith.constant 0 : i32
    %c0_i32_1 = arith.constant 0 : i32
    return %c0_i32, %c0_i32_0 : i32, i32
  }
  func.func @transform_6(%arg0: i32) -> (i32, i32) {
    %c0_i32 = arith.constant 0 : i32
    %c0_i32_0 = arith.constant 0 : i32
    return %arg0, %c0_i32 : i32, i32
  }
}

</mosaic_0001>

<bundles_post_ra>
// kernel: tpu_custom_call.1
= control target key start
LH: loop header
LB: loop body
LE: loop exit
PB: predicated region body
PF: predicated region fallthrough
CT: control target
= control target key end

     0   :  { %11 = vsyncpa [#allocation3], 0  ;;  %s1930_s0 = inlined_call_operand.hbm [shape: bf16[2,16,16], index: 0, kind: input, shape index: {}]   ;;  %s1931_s1 = inlined_call_operand.vmem [shape: f32[32,128], index: 1, kind: input, shape index: {}]   ;;  %s1932_s2 = inlined_call_operand.vmem [shape: f32[32,1], index: 2, kind: input, shape index: {}]   ;;  %s1933_s3 = inlined_call_operand.hbm [shape: bf16[256,384], index: 3, kind: input, shape index: {}]   ;;  %s1934_s4 = inlined_call_operand.vmem [shape: f32[1,384], index: 4, kind: input, shape index: {}]   ;;  %s1935_s5 = inlined_call_operand.hbm [shape: bf16[128,128], index: 5, kind: input, shape index: {}]   ;;  %s1936_s6 = inlined_call_operand.hbm [shape: f32[32,128], index: 6, kind: output, shape index: {}]  }
   0x1   :  { %13 = vsyncpa [#allocation3 + $0x1], 0 }
   0x2   :  { %14 = vsyncpa [#allocation6], 0 }
   0x3   :  { %15 = vsyncpa [#allocation4], 0 }
   0x4   :  { %17 = vsyncpa [#allocation4 + $0x1], 0  ;;  %s1736_s21 = smov 0   ;;  %s1738_s22 = smov 0  }
   0x5   :  { %s1740_s23 = smov 0   ;;  %s1742_s24 = smov 0  }
   0x6 LB: > { %s1757_s25 = sadd.s32 4294967295, %s1690_s24   ;;  %s1121_s26 = sadd.s32 4294967294, %s1690_s24   ;;  %s1690_s24 = sphi %s1742_s24, %s1950_s24   ;;  %s1686_s23 = sphi %s1740_s23, %s1949_s23   ;;  %s1682_s22 = sphi %s1738_s22, %s1948_s22   ;;  %s1678_s21 = sphi %s1736_s21, %s1947_s21  }
   0x7   : > { %p43_p0 = scmp.ne.s32.totalorder %s1682_s22, %s1678_s21  ;;  %p44_p1 = scmp.eq.s32.totalorder %s1757_s25, 0 }
   0x8   : > { %p182_p2 = scmp.eq.s32.totalorder %s1757_s25, 1  ;;  %p188_p3 = scmp.eq.s32.totalorder %s1121_s26, 1 }
   0x9   : > { %p1766_p4 = por %p44_p1, %p43_p0  ;;  %p1122_p5 = scmp.ge.s32.totalorder %s1690_s24, 1 }
   0xa   : > { %p1771_p6 = por %p188_p3, %p43_p0  ;;  %p195_p7 = scmp.lt.s32.totalorder %s1690_s24, 3 }
   0xb   : > { %s206_s7 = sshll.u32 %s1933_s3, 4  ;;  %s1692_s9 = smov [#allocation5]   ;;  %s207_s7 = int_to_ptr.hbm [resolvable:$true] %s206_s7 }
   0xc   : > { %p1779_p8 = pnand %p1122_p5, %p195_p7  ;;  %s208_s10 = sshll.u32 %s1692_s9, 4  ;;  %s209_s10 = int_to_ptr.vmem [resolvable:$true] %s208_s10 }
   0xd   : > { %s223_s13 = sshll.u32 %s1935_s5, 4  ;;  %s1693_s14 = smov 192   ;;  %s224_s13 = int_to_ptr.hbm [resolvable:$true] %s223_s13 }
   0xe   : > { %p1447_p9 = pneg %p1779_p8  ;;  %s1694_s15 = smov 12  }
   0xf   : > { %s1695_s16 = smov [#allocation7]   ;;  %s1937_s18 = smov 64  }
  0x10   : > { %p1448_p10 = pnand %p1447_p9, %p44_p1  ;;  %s225_s17 = sshll.u32 %s1695_s16, 4  ;;  %s226_s17 = int_to_ptr.vmem [resolvable:$true] %s225_s17 }
  0x11   : > { %s1938_s19 = smov 4   ;;  %s1795_s20 = sadd.s32 1, %s1690_s24  }
  0x12   : > { %1450 = dma.hbm_to_vmem [thread:$0]  (!%p1448_p10), %s207_s7, 6144, %s209_s10, [#allocation6], %s1693_s14, %s1693_s14, %s1694_s15  }
  0x13   : > { %1453 = dma.hbm_to_vmem [thread:$0]  (!%p1448_p10), %s224_s13, 1024, %s226_s17, [#allocation6], %s1937_s18, %s1937_s18, %s1938_s19  }
  0x14   : > { %s27_s26 = ssub.s32 %s1690_s24, %s1795_s20  ;;  %s30_s29 = sadd.s32 1, %s1686_s23 }
  0x15   : > { %p28_p12 = scmp.eq.s32.totalorder %s27_s26, 0  ;;  %p37_p13 = scmp.ne.s32.totalorder %s1686_s23, %s1682_s22 }
  0x16   : > { %p38_p0 = scmp.eq.s32.totalorder %s1690_s24, 0  ;;  %p1464_p7 = scmp.lt.s32.totalorder %s1690_s24, 2 }
  0x17   : > { %s1804_s30 = scalar_select %p28_p12, %s1686_s23, %s30_s29  }
  0x18   : > { %p39_p3 = por %p38_p0, %p37_p13  ;;  %p1808_p5 = por %p182_p2, %p37_p13 }
  0x19   : > { %s239_s9 = sand.u32 1, %s1686_s23   ;;  %s1376_s11 = sshll.u32 %s1690_s24, 3 }
  0x1a   : > { %s1126_s10 = sshll.u32 %s239_s9, 3  ;;  %s248_s14 = scalar_lea.hbm %s1930_s0, %s1376_s11 }
  0x1b   : > { %s243_s15 = scalar_lea.vmem [#allocation2], %s1126_s10  ;;  %s249_s17 = sshll.u32 %s248_s14, 4  ;;  %s250_s17 = int_to_ptr.hbm [resolvable:$true] %s249_s17 }
  0x1c   : > { %s251_s16 = sshll.u32 %s243_s15, 4  ;;  %p1818_p9 = pnand %p1464_p7, %p39_p3  ;;  %s252_s16 = int_to_ptr.vmem [resolvable:$true] %s251_s16 }
  0x1d   : > { %s240_s29 = scalar_lea.sflag [#allocation3], %s239_s9  ;;  %s1590_s18 = sshra.s32 %s250_s17, 4  ;;  %s1591_s18 = int_to_ptr.hbm [resolvable:$true] %s1590_s18 }
  0x1e   : > { %s1592_s19 = scalar_lea.hbm %s1591_s18, 8  ;;  %p1594_p10 = pneg %p1818_p9 }
  0x1f   : > { %p1593_p2 = scmp.ne.s32.totalorder %s1591_s18, %s1592_s19  ;;  %s1597_s12 = scalar_lea.hbm %s1930_s0, 16 }
  0x20   : > { %p1598_p0 = scmp.lt.s32.totalorder %s1591_s18, %s1930_s0  ;;  %p1599_p3 = scmp.lt.s32.totalorder %s1597_s12, %s1592_s19 }
  0x21   : > { %p1595_p12 = pnand %p1594_p10, %p1593_p2 }
  0x22   : > { %p1600_p7 = por %p1599_p3, %p1598_p0 }
  0x23   : > { %p1596_p13 = pneg %p1595_p12 }
  0x25   : > { %p1601_p11 = pnand %p1600_p7, %p1596_p13 }
  0x27   : > { %1604 = shalt.err (!%p1601_p11)
}
  0x28   : > { %s1944_s9 = smov 4   ;;  %s1945_s15 = smov 64  }
  0x29   : > { %1457 = dma.hbm_to_vmem [thread:$0]  (!%p1818_p9), %s250_s17, 128, %s252_s16, %s240_s29, %s1945_s15, %s1945_s15, %s1944_s9  }
  0x2a   : > { %281 = sbr.rel (%p1779_p8) target bundleno = 543 (0x21f), region = 44  ;;  %s1838_s11 = sand.u32 (!%p1779_p8), 1, %s1682_s22  }
  0x2b   : > { %s1130_s18 = sshll.u32 (!%p1779_p8), %s1838_s11, 3  ;;  %s284_s19 = scalar_lea.sflag (!%p1779_p8), [#allocation3], %s1838_s11 }
  0x2c   : > { %s1842_s10 = scalar_lea.vmem (!%p1779_p8), [#allocation2], %s1130_s18 }
  0x2f   : > { %1665 = dma.done.wait (%p1766_p4), %s284_s19, 128  }
  0x30   : > { %1667 = vsyncadd (%p1766_p4), %s284_s19, 4294967168 }
  0x31   : > { %1669 = dma.done.wait (%p44_p1), [#allocation6], 7168  }
  0x32   : > { %1671 = vsyncadd (%p44_p1), [#allocation6], 4294960128  ;;  %s1134_s8 = sshll.u32 %s1757_s25, 1  ;;  %v1325_v4 = vld [vmem:[#allocation5 + $0x168] sm:$0xf]  ;;  %v1377_v21 = vld [vmem:[%s1842_s10] sm:$0xff] }
  0x33   : > { %p338_p8 = scmp.lt.s32.totalorder %s1134_s8, 3  ;;  %v1424_v5 = vld [vmem:[#allocation5 + $0x170] sm:$0xf0]  ;;  %v1229_v6 = vld [vmem:[#allocation5 + $0xa8] sm:$0xf]  ;;  %vm370_vm0 = vcmask 130048  }
  0x34   : > { %v1326_v7 = vor.u32 %v1424_v5, %v1325_v4  ;;  %v1400_v8 = vld [vmem:[#allocation5 + $0xb0] sm:$0xf0]  ;;  %v1313_v9 = vld [vmem:[#allocation5 + $0x150] sm:$0xf]  ;;  %v1421_v10 = vld [vmem:[#allocation5 + $0x158] sm:$0xf0] }
  0x35   : > { %s1952_s8 = smov (!%p338_p8, %s1134_s8), 3  ;;  %v1230_v13 = vor.u32 %v1400_v8, %v1229_v6  ;;  %v1217_v14 = vld [vmem:[#allocation5 + $0x90] sm:$0xf]  ;;  %v1397_v15 = vld [vmem:[#allocation5 + $0x98] sm:$0xf0]  ;;  %v1314_v16 = vor.u32 %v1421_v10, %v1313_v9  ;;  %s1133_s15 = sshll.u32 %s1838_s11, 4 }
  0x36   : > { %s1135_s16 = sshll.u32 %s1952_s8, 3  ;;  %738 = vmatpush.bf16.msra.mxu2 %v1326_v7  ;;  %v1218_v18 = vor.u32 %v1397_v15, %v1217_v14  ;;  %v1301_v19 = vld [vmem:[#allocation5 + $0x138] sm:$0xf]  ;;  %v1418_v20 = vld [vmem:[#allocation5 + $0x140] sm:$0xf0]  ;;  %s1434_s18 = sshll.u32 %s1757_s25, 4 }
  0x37   : > { %s341_s27 = scalar_lea.vmem %s1931_s1, %s1135_s16  ;;  %724 = vmatpush.bf16.msra.mxu1 %v1230_v13  ;;  %v1205_v22 = vld [vmem:[#allocation5 + $0x78] sm:$0xf]  ;;  %v1394_v23 = vld [vmem:[#allocation5 + $0x80] sm:$0xf0]  ;;  %v1399_v24 = vld [vmem:[#allocation5 + $0xac] sm:$0xf]  ;;  %v1302_v27 = vor.u32 %v1418_v20, %v1301_v19  ;;  %s347_s9 = scalar_lea.vmem %s1932_s2, %s1135_s16 }
  0x38   : > { %v1861_v0 = vld [vmem:[%s341_s27] sm:$0xff]  ;;  %v1863_v1 = vld [vmem:[%s341_s27 + $0x8] sm:$0xff]  ;;  %v1423_v26 = vld [vmem:[#allocation5 + $0x16c] sm:$0xf]  ;;  %v1206_v32 = vor.u32 %v1394_v23, %v1205_v22  ;;  %s1001_s8 = scalar_lea.hbm %s1936_s6, %s1434_s18  ;;  %s336_s16 = scalar_lea.vmem [#allocation8], %s1133_s15 }
  0x39   : > { %v353_v2 = vpack.c.bf16 %v1861_v0, %v1861_v0  ;;  %v354_v3 = vpack.c.bf16 %v1863_v1, %v1863_v1  ;;  %v1231_v25 = vld [vmem:[#allocation5 + $0xb4] sm:$0xf0]  ;;  %v1289_v28 = vld [vmem:[#allocation5 + $0x120] sm:$0xf]  ;;  %v1415_v29 = vld [vmem:[#allocation5 + $0x128] sm:$0xf0] }
  0x3a   : > { %739 = vmatpush.bf16.msra.mxu2 %v1314_v16  ;;  %v1234_v30 = vor.u32 %v1399_v24, %v1231_v25  ;;  %v1327_v31 = vld [vmem:[#allocation5 + $0x174] sm:$0xf0]  ;;  %v1193_v33 = vld [vmem:[#allocation5 + $0x60] sm:$0xf]  ;;  %v1391_v34 = vld [vmem:[#allocation5 + $0x68] sm:$0xf0]  ;;  %v1290_v42 = vor.u32 %v1415_v29, %v1289_v28 }
  0x3b   : > { %v366_v11 = vunpack.c.l.b16 %v353_v2  ;;  %v367_v12 = vunpack.c.l.b16 %v354_v3  ;;  %725 = vmatpush.bf16.msra.mxu1 %v1218_v18  ;;  %v1330_v35 = vor.u32 %v1423_v26, %v1327_v31  ;;  %v1396_v36 = vld [vmem:[#allocation5 + $0x94] sm:$0xf]  ;;  %v1219_v37 = vld [vmem:[#allocation5 + $0x9c] sm:$0xf0]  ;;  %v1277_v43 = vld [vmem:[#allocation5 + $0x108] sm:$0xf]  ;;  %v1194_v46 = vor.u32 %v1391_v34, %v1193_v33 }
  0x3c   : > { %752 = vmatpush.bf16.msra.mxu3 %v1234_v30  ;;  %v1420_v38 = vld [vmem:[#allocation5 + $0x154] sm:$0xf]  ;;  %v1315_v39 = vld [vmem:[#allocation5 + $0x15c] sm:$0xf0]  ;;  %v1222_v40 = vor.u32 %v1396_v36, %v1219_v37  ;;  %v1393_v44 = vld [vmem:[#allocation5 + $0x7c] sm:$0xf] }
  0x3d   : > { %v1869_v17 = vpack.c.b16 %v367_v12, %v366_v11  ;;  %v1318_v41 = vor.u32 %v1420_v38, %v1315_v39  ;;  %v1207_v45 = vld [vmem:[#allocation5 + $0x84] sm:$0xf0]  ;;  %v1412_v47 = vld [vmem:[#allocation5 + $0x110] sm:$0xf0]  ;;  %v1417_v48 = vld [vmem:[#allocation5 + $0x13c] sm:$0xf] }
  0x3e   : > { %740 = vmatpush.bf16.msra.mxu2 %v1302_v27  ;;  %v1303_v49 = vld [vmem:[#allocation5 + $0x144] sm:$0xf0]  ;;  %v1388_v51 = vld [vmem:[#allocation5 + $0x50] sm:$0xf0]  ;;  %v1210_v52 = vor.u32 %v1393_v44, %v1207_v45  ;;  %v1390_v54 = vld [vmem:[#allocation5 + $0x64] sm:$0xf]  ;;  %v1278_v56 = vor.u32 %v1412_v47, %v1277_v43 }
  0x3f   : > { %381 = vmatpush.bf16.msra.mxu0 %v1869_v17  ;;  %726 = vmatpush.bf16.msra.mxu1 %v1206_v32  ;;  %v1181_v50 = vld [vmem:[#allocation5 + $0x48] sm:$0xf]  ;;  %v1306_v53 = vor.u32 %v1417_v48, %v1303_v49  ;;  %v1195_v55 = vld [vmem:[#allocation5 + $0x6c] sm:$0xf0]  ;;  %v1414_v57 = vld [vmem:[#allocation5 + $0x124] sm:$0xf] }
  0x40   : > { %753 = vmatpush.bf16.msra.mxu3 %v1222_v40  ;;  %v1291_v58 = vld [vmem:[#allocation5 + $0x12c] sm:$0xf0]  ;;  %v1182_v59 = vor.u32 %v1388_v51, %v1181_v50  ;;  %v1409_v61 = vld [vmem:[#allocation5 + $0xf8] sm:$0xf0]  ;;  %v1198_v2 = vor.u32 %v1390_v54, %v1195_v55  ;;  %v1253_v6 = vld [vmem:[#allocation5 + $0xd8] sm:$0xf] }
  0x41   : > { %v1265_v60 = vld [vmem:[#allocation5 + $0xf0] sm:$0xf]  ;;  %v1385_v63 = vld [vmem:[#allocation5 + $0x38] sm:$0xf0]  ;;  %v1294_v3 = vor.u32 %v1414_v57, %v1291_v58  ;;  %v1406_v7 = vld [vmem:[#allocation5 + $0xe0] sm:$0xf0] }
  0x42   : > { %1142 = vmatmul.msk.bf16.vlgmr.msra.gmra.mxu0 %vm370_vm0, %v1377_v21  ;;  %741 = vmatpush.bf16.msra.mxu2 %v1290_v42  ;;  %v1169_v62 = vld [vmem:[#allocation5 + $0x30] sm:$0xf]  ;;  %v1266_v4 = vor.u32 %v1409_v61, %v1265_v60  ;;  %v1157_v8 = vld [vmem:[#allocation5 + $0x18] sm:$0xf]  ;;  %v1382_v9 = vld [vmem:[#allocation5 + $0x20] sm:$0xf0]  ;;  %v1254_v10 = vor.u32 %v1406_v7, %v1253_v6 }
  0x43   : > { %766 = vmatpush.bf16.msrb.mxu0 %v1330_v35  ;;  %727 = vmatpush.bf16.msra.mxu1 %v1194_v46  ;;  %v1170_v5 = vor.u32 %v1385_v63, %v1169_v62  ;;  %v1158_v11 = vor.u32 %v1382_v9, %v1157_v8  ;;  %v1241_v12 = vld [vmem:[#allocation5 + $0xc0] sm:$0xf]  ;;  %v1403_v13 = vld [vmem:[#allocation5 + $0xc8] sm:$0xf0]  ;;  %v1333_v14 = vld [vmem:[#allocation5 + $0x170] sm:$0xf] }
  0x44   : > { %754 = vmatpush.bf16.msra.mxu3 %v1210_v52  ;;  %v1425_v15 = vld [vmem:[#allocation5 + $0x178] sm:$0xf0]  ;;  %v1145_v16 = vld [vmem:[#allocation5] sm:$0xf]  ;;  %v1379_v18 = vld [vmem:[#allocation5 + $0x8] sm:$0xf0]  ;;  %v1242_v19 = vor.u32 %v1403_v13, %v1241_v12 }
  0x45   : > { %v1334_v20 = vor.u32 %v1425_v15, %v1333_v14  ;;  %v1146_v21 = vor.u32 %v1379_v18, %v1145_v16  ;;  %v1387_v22 = vld [vmem:[#allocation5 + $0x4c] sm:$0xf]  ;;  %v1183_v23 = vld [vmem:[#allocation5 + $0x54] sm:$0xf0]  ;;  %v1237_v27 = vld [vmem:[#allocation5 + $0xb0] sm:$0xf] }
  0x46   : > { %742 = vmatpush.bf16.msra.mxu2 %v1278_v56  ;;  %v1411_v24 = vld [vmem:[#allocation5 + $0x10c] sm:$0xf]  ;;  %v1186_v25 = vor.u32 %v1387_v22, %v1183_v23  ;;  %v1279_v26 = vld [vmem:[#allocation5 + $0x114] sm:$0xf0]  ;;  %v1401_v28 = vld [vmem:[#allocation5 + $0xb8] sm:$0xf0] }
  0x47   : > { %767 = vmatpush.bf16.msrb.mxu0 %v1318_v41  ;;  %728 = vmatpush.bf16.msra.mxu1 %v1182_v59  ;;  %v1282_v29 = vor.u32 %v1411_v24, %v1279_v26  ;;  %v1238_v30 = vor.u32 %v1401_v28, %v1237_v27  ;;  %v1321_v31 = vld [vmem:[#allocation5 + $0x158] sm:$0xf]  ;;  %v1422_v32 = vld [vmem:[#allocation5 + $0x160] sm:$0xf0]  ;;  %v1384_v34 = vld [vmem:[#allocation5 + $0x34] sm:$0xf] }
  0x48   : > { %755 = vmatpush.bf16.msra.mxu3 %v1198_v2  ;;  %v1322_v33 = vor.u32 %v1422_v32, %v1321_v31  ;;  %v1171_v35 = vld [vmem:[#allocation5 + $0x3c] sm:$0xf0]  ;;  %v1408_v36 = vld [vmem:[#allocation5 + $0xf4] sm:$0xf]  ;;  %v1225_v39 = vld [vmem:[#allocation5 + $0x98] sm:$0xf] }
  0x49   : > { %v1174_v37 = vor.u32 %v1384_v34, %v1171_v35  ;;  %v1267_v38 = vld [vmem:[#allocation5 + $0xfc] sm:$0xf0]  ;;  %v1398_v40 = vld [vmem:[#allocation5 + $0xa0] sm:$0xf0]  ;;  %v1419_v44 = vld [vmem:[#allocation5 + $0x148] sm:$0xf0] }
  0x4a   : > { %743 = vmatpush.bf16.msra.mxu2 %v1266_v4  ;;  %v1270_v41 = vor.u32 %v1408_v36, %v1267_v38  ;;  %v1226_v42 = vor.u32 %v1398_v40, %v1225_v39  ;;  %v1309_v43 = vld [vmem:[#allocation5 + $0x140] sm:$0xf]  ;;  %v1381_v46 = vld [vmem:[#allocation5 + $0x1c] sm:$0xf]  ;;  %v1159_v47 = vld [vmem:[#allocation5 + $0x24] sm:$0xf0] }
  0x4b   : > { %768 = vmatpush.bf16.msrb.mxu0 %v1306_v53  ;;  %729 = vmatpush.bf16.msra.mxu1 %v1170_v5  ;;  %v1310_v45 = vor.u32 %v1419_v44, %v1309_v43  ;;  %v1405_v48 = vld [vmem:[#allocation5 + $0xdc] sm:$0xf]  ;;  %v1162_v49 = vor.u32 %v1381_v46, %v1159_v47  ;;  %v1255_v50 = vld [vmem:[#allocation5 + $0xe4] sm:$0xf0]  ;;  %v1213_v51 = vld [vmem:[#allocation5 + $0x80] sm:$0xf] }
  0x4c   : > { %756 = vmatpush.bf16.msra.mxu3 %v1186_v25  ;;  %v1395_v52 = vld [vmem:[#allocation5 + $0x88] sm:$0xf0]  ;;  %v1258_v53 = vor.u32 %v1405_v48, %v1255_v50  ;;  %v1297_v55 = vld [vmem:[#allocation5 + $0x128] sm:$0xf]  ;;  %v1416_v56 = vld [vmem:[#allocation5 + $0x130] sm:$0xf0] }
  0x4d   : > { %v1214_v54 = vor.u32 %v1395_v52, %v1213_v51  ;;  %v1298_v57 = vor.u32 %v1416_v56, %v1297_v55  ;;  %v1378_v58 = vld [vmem:[#allocation5 + $0x4] sm:$0xf]  ;;  %v1147_v59 = vld [vmem:[#allocation5 + $0xc] sm:$0xf0]  ;;  %v1201_v63 = vld [vmem:[#allocation5 + $0x68] sm:$0xf] }
  0x4e   : > { %744 = vmatpush.bf16.msra.mxu2 %v1254_v10  ;;  %v1402_v60 = vld [vmem:[#allocation5 + $0xc4] sm:$0xf]  ;;  %v1150_v61 = vor.u32 %v1378_v58, %v1147_v59  ;;  %v1243_v62 = vld [vmem:[#allocation5 + $0xcc] sm:$0xf0]  ;;  %v1392_v2 = vld [vmem:[#allocation5 + $0x70] sm:$0xf0] }
  0x4f   : > { %769 = vmatpush.bf16.msrb.mxu0 %v1294_v3  ;;  %730 = vmatpush.bf16.msra.mxu1 %v1158_v11  ;;  %v1246_v3 = vor.u32 %v1402_v60, %v1243_v62  ;;  %v1202_v4 = vor.u32 %v1392_v2, %v1201_v63  ;;  %v1285_v5 = vld [vmem:[#allocation5 + $0x110] sm:$0xf]  ;;  %v1413_v6 = vld [vmem:[#allocation5 + $0x118] sm:$0xf0]  ;;  %v1273_v10 = vld [vmem:[#allocation5 + $0xf8] sm:$0xf] }
  0x50   : > { %757 = vmatpush.bf16.msra.mxu3 %v1174_v37  ;;  %v1286_v7 = vor.u32 %v1413_v6, %v1285_v5  ;;  %v1189_v8 = vld [vmem:[#allocation5 + $0x50] sm:$0xf]  ;;  %v1389_v9 = vld [vmem:[#allocation5 + $0x58] sm:$0xf0]  ;;  %v1410_v12 = vld [vmem:[#allocation5 + $0x100] sm:$0xf0] }
  0x51   : > { %v1190_v11 = vor.u32 %v1389_v9, %v1189_v8  ;;  %v1274_v13 = vor.u32 %v1410_v12, %v1273_v10  ;;  %v1177_v14 = vld [vmem:[#allocation5 + $0x38] sm:$0xf]  ;;  %v1386_v15 = vld [vmem:[#allocation5 + $0x40] sm:$0xf0]  ;;  %v1261_v16 = vld [vmem:[#allocation5 + $0xe0] sm:$0xf] }
  0x52   : > { %745 = vmatpush.bf16.msra.mxu2 %v1242_v19  ;;  %v1407_v18 = vld [vmem:[#allocation5 + $0xe8] sm:$0xf0]  ;;  %v1178_v19 = vor.u32 %v1386_v15, %v1177_v14  ;;  %v1249_v23 = vld [vmem:[#allocation5 + $0xc8] sm:$0xf]  ;;  %v1404_v24 = vld [vmem:[#allocation5 + $0xd0] sm:$0xf0] }
  0x53   : > { %731 = vmatpush.bf16.msra.mxu1 %v1146_v21  ;;  %770 = vmatpush.bf16.msrb.mxu0 %v1282_v29  ;;  %v1165_v21 = vld [vmem:[#allocation5 + $0x20] sm:$0xf]  ;;  %v1383_v22 = vld [vmem:[#allocation5 + $0x28] sm:$0xf0]  ;;  %v1250_v26 = vor.u32 %v1404_v24, %v1249_v23  ;;  %v1153_v27 = vld [vmem:[#allocation5 + $0x8] sm:$0xf] }
  0x54   : > { %758 = vmatpush.bf16.msra.mxu3 %v1162_v49  ;;  %v1166_v25 = vor.u32 %v1383_v22, %v1165_v21  ;;  %v1380_v28 = vld [vmem:[#allocation5 + $0x10] sm:$0xf0]  ;;  %v1433_v37 = vld [vmem:[#allocation7 + $0x38] sm:$0xff]  ;;  %v1431_v39 = vld [vmem:[#allocation7 + $0x28] sm:$0xff]  ;;  %v1698_v59 = vmov 0   ;;  %s1002_s25 = sshll.u32 %s336_s16, 4  ;;  %s1003_s25 = int_to_ptr.vmem [resolvable:$true] %s1002_s25 }
  0x55   : > { %746 = vmatmul.bf16.vlgmr.msra.gmra.mxu2 %v1869_v17  ;;  %v1154_v29 = vor.u32 %v1380_v28, %v1153_v27  ;;  %v1432_v38 = vld [vmem:[#allocation7 + $0x30] sm:$0xff]  ;;  %v1430_v40 = vld [vmem:[#allocation7 + $0x20] sm:$0xff]  ;;  %v1427_v47 = vld [vmem:[#allocation7 + $0x8] sm:$0xff]  ;;  %1509 = vset.pattern.permute.xlu0 %v1698_v59  ;;  %s1004_s17 = sshll.u32 %s1001_s8, 4  ;;  %s990_s26 = scalar_lea.sflag [#allocation4], %s1838_s11  ;;  %s1005_s17 = int_to_ptr.hbm [resolvable:$true] %s1004_s17 }
  0x56   : > { %794 = vmatpush.bf16.msrb.mxu2 %v1334_v20  ;;  %v1262_v20 = vor.u32 %v1407_v18, %v1261_v16  ;;  %v1428_v43 = vld [vmem:[#allocation7 + $0x10] sm:$0xff]  ;;  %v1426_v50 = vld [vmem:[#allocation7] sm:$0xff]  ;;  %v356_v60 = vld [vmem:[%s347_s9 + $0x8] sm:$0xff]  ;;  %s1634_s27 = sshra.s32 %s1005_s17, 4  ;;  %s1640_s14 = scalar_lea.hbm %s1936_s6, 32  ;;  %s1635_s27 = int_to_ptr.hbm [resolvable:$true] %s1634_s27 }
  0x57   : > { %780 = vmatpush.bf16.msrb.mxu1 %v1238_v30  ;;  %771 = vmatpush.bf16.msrb.mxu0 %v1270_v41  ;;  %v1429_v41 = vld [vmem:[#allocation7 + $0x18] sm:$0xff]  ;;  %s1636_s29 = scalar_lea.hbm %s1635_s27, 16  ;;  %p1641_p9 = scmp.lt.s32.totalorder %s1635_s27, %s1936_s6 }
  0x58   : > { %759 = vmatpush.bf16.msra.mxu3 %v1150_v61  ;;  %p1637_p1 = scmp.ne.s32.totalorder %s1635_s27, %s1636_s29  ;;  %p1642_p2 = scmp.lt.s32.totalorder %s1640_s14, %s1636_s29 }
  0x5a   : > { %795 = vmatpush.bf16.msrb.mxu2 %v1322_v33  ;;  %p1638_p4 = pnand %p1637_p1, %p1808_p5  ;;  %p1643_p10 = por %p1642_p2, %p1641_p9 }
  0x5b   : > { %781 = vmatpush.bf16.msrb.mxu1 %v1226_v42  ;;  %772 = vmatpush.bf16.msrb.mxu0 %v1258_v53 }
  0x5c   : > { %951 = vmatpush.bf16.msrb.mxu3 %v1433_v37  ;;  %p1639_p11 = pneg %p1638_p4 }
  0x5e   : > { %796 = vmatpush.bf16.msrb.mxu2 %v1310_v45  ;;  %p1644_p12 = pnand %p1643_p10, %p1639_p11 }
  0x5f   : > { %782 = vmatpush.bf16.msrb.mxu1 %v1214_v54  ;;  %773 = vmatpush.bf16.msrb.mxu0 %v1246_v3 }
  0x60   : > { %952 = vmatpush.bf16.msrb.mxu3 %v1432_v38 }
  0x62   : > { %797 = vmatpush.bf16.msrb.mxu2 %v1298_v57  ;;  %774 = vmatmul.bf16.vlgmr.msrb.gmra.mxu0 %v1869_v17  ;;  %v355_v57 = vld [vmem:[%s347_s9] sm:$0xff] }
  0x63   : > { %783 = vmatpush.bf16.msrb.mxu1 %v1202_v4  ;;  %969 = vperm.xlu0 %1509, %v355_v57  }
  0x64   : > { %953 = vmatpush.bf16.msrb.mxu3 %v1431_v39 }
  0x66   : > { %798 = vmatpush.bf16.msrb.mxu2 %v1286_v7 }
  0x67   : > { %784 = vmatpush.bf16.msrb.mxu1 %v1190_v11 }
  0x68   : > { %954 = vmatpush.bf16.msrb.mxu3 %v1430_v40 }
  0x6a   : > { %799 = vmatpush.bf16.msrb.mxu2 %v1274_v13 }
  0x6b   : > { %785 = vmatpush.bf16.msrb.mxu1 %v1178_v19  ;;  %974 = vperm.xlu0 %1509, %v356_v60  }
  0x6c   : > { %955 = vmatpush.bf16.msrb.mxu3 %v1429_v41 }
  0x6e   : > { %800 = vmatpush.bf16.msrb.mxu2 %v1262_v20 }
  0x6f   : > { %786 = vmatpush.bf16.msrb.mxu1 %v1166_v25 }
  0x70   : > { %956 = vmatpush.bf16.msrb.mxu3 %v1428_v43 }
  0x72   : > { %801 = vmatpush.bf16.msrb.mxu2 %v1250_v26 }
  0x73   : > { %787 = vmatpush.bf16.msrb.mxu1 %v1154_v29 }
  0x74   : > { %957 = vmatpush.bf16.msrb.mxu3 %v1427_v47 }
  0x75   : > { %802 = vmatmul.bf16.vlgmr.msrb.gmra.mxu2 %v1869_v17  ;;  %v1880_v17 = vld [vmem:[%s1934_s4] sm:$0x7] }
  0x76   : > { %v463_v42 = vperm.slane %v1880_v17, 1  ;;  %v462_v26 = vperm.slane %v1880_v17, 0 }
  0x78   : > { %958 = vmatpush.bf16.msrb.mxu3 %v1426_v50 }
  0xbf   : > { %v383_v30 = vpop.f32.mrf.mxu0 }
  0xc0   : > { %v388_v31 = vpack.c.bf16 %v383_v30, %v383_v30 }
  0xc2   : > { %v392_v34 = vunpack.c.l.b16 %v388_v31 }
  0xc7   : > { %v385_v32 = vpop.f32.mrf.mxu0 }
  0xc8   : > { %v389_v33 = vpack.c.bf16 %v385_v32, %v385_v32 }
  0xca   : > { %v393_v35 = vunpack.c.l.b16 %v389_v33 }
  0xcc   : > { %v394_v36 = vpack.c.b16 %v393_v35, %v392_v34 }
  0xce   : > { %732 = vmatmul.bf16.vlgmr.msra.gmra.mxu1 %v394_v36  ;;  %760 = vmatmul.bf16.vlgmr.msra.gmra.mxu3 %v394_v36 }
  0xd5   : > { %v970_v50 = vpop.permute.xlu0 %969 }
  0xd8   : > { %v747_v27 = vpop.f32.mrf.mxu2 }
  0xde   : > { %788 = vmatmul.bf16.vlgmr.msrb.gmra.mxu1 %v394_v36 }
  0xdf   : > { %v775_v44 = vpop.f32.mrf.mxu0 }
  0xe0   : > { %v749_v33 = vpop.f32.mrf.mxu2 }
  0xe7   : > { %v777_v53 = vpop.f32.mrf.mxu0 }
 0x14b   : > { %v733_v25 = vpop.f32.mrf.mxu1 }
 0x14c   : > { %v734_v28 = vadd.f32 %v733_v25, %v462_v26 }
 0x14e   : > { %v748_v29 = vadd.f32 %v747_v27, %v734_v28 }
 0x150   : > { %v1335_v31 = vmul.f32 -1.442695, %v748_v29 }
 0x151   : > { %v761_v45 = vpop.f32.mrf.mxu3 }
 0x152   : > { %v762_v46 = vadd.f32 %v761_v45, %v463_v42 }
 0x153   : > { %v735_v30 = vpop.f32.mrf.mxu1 }
 0x154   : > { %v776_v48 = vadd.f32 %v775_v44, %v762_v46  ;;  %v736_v32 = vadd.f32 %v735_v30, %v462_v26  ;;  %v803_v44 = vpop.f32.mrf.mxu2 }
 0x156   : > { %v1337_v49 = vmul.f32 -1.442695, %v776_v48  ;;  %v750_v34 = vadd.f32 %v749_v33, %v736_v32 }
 0x158   : > { %1510 = vpow2.f32 %v1337_v49  ;;  %v1336_v35 = vmul.f32 -1.442695, %v750_v34 }
 0x159   : > { %v763_v51 = vpop.f32.mrf.mxu3 }
 0x15a   : > { %v764_v52 = vadd.f32 %v763_v51, %v463_v42  ;;  %v464_v42 = vperm.slane %v1880_v17, 2 }
 0x15b   : > { %v789_v40 = vpop.f32.mrf.mxu1 }
 0x15c   : > { %v778_v54 = vadd.f32 %v777_v53, %v764_v52  ;;  %v790_v45 = vadd.f32 %v789_v40, %v464_v42  ;;  %v805_v57 = vpop.f32.mrf.mxu2 }
 0x15e   : > { %v1511_v55 = vpop.eup %1510  ;;  %v1338_v56 = vmul.f32 -1.442695, %v778_v54  ;;  %v804_v48 = vadd.f32 %v803_v44, %v790_v45 }
 0x15f   : > { %v852_v58 = vadd.f32 1.0, %v1511_v55 }
 0x160   : > { %1512 = vpow2.f32 %v1338_v56 }
 0x161   : > { %1514 = vrcp.f32 %v852_v58  ;;  %v865_v8 = vand.u32 2147483648, %v852_v58  ;;  %vm859_vm2 = vweird.f32 %v852_v58  ;;  %v863_v9 = vand.u32 2147483647, %v852_v58 }
 0x163   : > { %v866_v15 = vor.u32 1.1754944e-38, %v865_v8  ;;  %vm864_vm5 = vcmp.eq.f32.partialorder %v863_v9, 8.507059e+37  ;;  %v791_v49 = vpop.f32.mrf.mxu1 }
 0x164   : > { %v792_v55 = vadd.f32 %v791_v49, %v464_v42 }
 0x166   : > { %v1513_v61 = vpop.eup %1512  ;;  %v806_v60 = vadd.f32 %v805_v57, %v792_v55 }
 0x167   : > { %v1515_v62 = vpop.eup %1514  ;;  %v853_v63 = vadd.f32 1.0, %v1513_v61 }
 0x168   : > { %v855_v2 = vmul.f32 %v1515_v62, %v852_v58  ;;  %vm860_vm1 = vweird.f32 %v1515_v62 }
 0x169   : > { %1516 = vrcp.f32 %v853_v63  ;;  %vm861_vm3 = vmor %vm859_vm2, %vm860_vm1  ;;  %v880_v11 = vand.u32 2147483648, %v853_v63  ;;  %v878_v14 = vand.u32 2147483647, %v853_v63  ;;  %vm874_vm6 = vweird.f32 %v853_v63 }
 0x16a   : > { %v856_v3 = vsub.f32 1.0, %v855_v2  ;;  %1518 = vpow2.f32 %v1335_v31 }
 0x16b   : > { %v881_v19 = vor.u32 1.1754944e-38, %v880_v11  ;;  %vm879_vm8 = vcmp.eq.f32.partialorder %v878_v14, 8.507059e+37  ;;  %1520 = vpow2.f32 %v1336_v35 }
 0x16c   : > { %v857_v4 = vmul.f32 %v1515_v62, %v856_v3 }
 0x16e   : > { %v858_v7 = vadd.f32 %v1515_v62, %v857_v4  ;;  %v975_v4 = vpop.permute.xlu0 %974 }
 0x16f   : > { %v1517_v5 = vpop.eup %1516 }
 0x170   : > { %v870_v6 = vmul.f32 %v1517_v5, %v853_v63  ;;  %v862_v12 = vsel %vm861_vm3, %v1515_v62, %v858_v7  ;;  %vm875_vm4 = vweird.f32 %v1517_v5  ;;  %v1519_v36 = vpop.eup %1518 }
 0x171   : > { %v867_v18 = vsel %vm864_vm5, %v866_v15, %v862_v12  ;;  %vm876_vm7 = vmor %vm874_vm6, %vm875_vm4  ;;  %v814_v37 = vadd.f32 1.0, %v1519_v36  ;;  %v1521_v38 = vpop.eup %1520 }
 0x172   : > { %v871_v10 = vsub.f32 1.0, %v870_v6  ;;  %v884_v22 = vmul.f32 %v867_v18, %v1861_v0  ;;  %v815_v39 = vadd.f32 1.0, %v1521_v38 }
 0x173   : > { %1522 = vrcp.f32 %v814_v37  ;;  %v827_v59 = vand.u32 2147483648, %v814_v37  ;;  %vm821_vm10 = vweird.f32 %v814_v37  ;;  %v825_v61 = vand.u32 2147483647, %v814_v37 }
 0x174   : > { %v872_v13 = vmul.f32 %v1517_v5, %v871_v10  ;;  %1524 = vrcp.f32 %v815_v39  ;;  %v842_v12 = vand.u32 2147483648, %v815_v39  ;;  %vm836_vm14 = vweird.f32 %v815_v39 }
 0x175   : > { %v828_v6 = vor.u32 1.1754944e-38, %v827_v59  ;;  %vm826_vm12 = vcmp.eq.f32.partialorder %v825_v61, 8.507059e+37  ;;  %v840_v14 = vand.u32 2147483647, %v815_v39 }
 0x176   : > { %v873_v16 = vadd.f32 %v1517_v5, %v872_v13  ;;  %v843_v18 = vor.u32 1.1754944e-38, %v842_v12 }
 0x177   : > { %vm841_vm0 = vcmp.eq.f32.partialorder %v840_v14, 8.507059e+37 }
 0x178   : > { %v877_v20 = vsel %vm876_vm7, %v1517_v5, %v873_v16 }
 0x179   : > { %v882_v21 = vsel %vm879_vm8, %v881_v19, %v877_v20  ;;  %v1523_v41 = vpop.eup %1522 }
 0x17a   : > { %v885_v23 = vmul.f32 %v882_v21, %v1863_v1  ;;  %v817_v43 = vmul.f32 %v1523_v41, %v814_v37  ;;  %v1525_v47 = vpop.eup %1524  ;;  %vm822_vm9 = vweird.f32 %v1523_v41 }
 0x17b   : > { %v832_v54 = vmul.f32 %v1525_v47, %v815_v39  ;;  %vm823_vm11 = vmor %vm821_vm10, %vm822_vm9  ;;  %vm837_vm13 = vweird.f32 %v1525_v47 }
 0x17c   : > { %v886_v24 = vpack.c.bf16 %v885_v23, %v884_v22  ;;  %v818_v46 = vsub.f32 1.0, %v817_v43  ;;  %vm838_vm15 = vmor %vm836_vm14, %vm837_vm13 }
 0x17d   : > { %v833_v58 = vsub.f32 1.0, %v832_v54 }
 0x17e   : > { %959 = vmatmul.bf16.vlgmr.msrb.gmra.mxu3 %v886_v24  ;;  %v819_v53 = vmul.f32 %v1523_v41, %v818_v46 }
 0x17f   : > { %v834_v2 = vmul.f32 %v1525_v47, %v833_v58 }
 0x180   : > { %v820_v17 = vadd.f32 %v1523_v41, %v819_v53 }
 0x181   : > { %v835_v11 = vadd.f32 %v1525_v47, %v834_v2 }
 0x182   : > { %v824_v3 = vsel %vm823_vm11, %v1523_v41, %v820_v17 }
 0x183   : > { %v829_v9 = vsel %vm826_vm12, %v828_v6, %v824_v3  ;;  %v839_v15 = vsel %vm838_vm15, %v1525_v47, %v835_v11 }
 0x184   : > { %v844_v20 = vsel %vm841_vm0, %v843_v18, %v839_v15 }
 0x201   : > { %v960_v51 = vpop.f32.mrf.mxu3 }
 0x202   : > { %v965_v52 = vadd.f32 %v960_v51, %v804_v48 }
 0x204   : > { %v977_v56 = vmul.f32 %v970_v50, %v965_v52 }
 0x206   : > { %1526 = vtanh.f32 %v977_v56 }
 0x209   : > { %v962_v62 = vpop.f32.mrf.mxu3 }
 0x20a   : > { %v966_v63 = vadd.f32 %v962_v62, %v806_v60 }
 0x20c   : > { %v1527_v5 = vpop.eup %1526  ;;  %v978_v7 = vmul.f32 %v975_v4, %v966_v63 }
 0x20d   : > { %v981_v8 = vsub.f32 %v1527_v5, %v1861_v0 }
 0x20e   : > { %1528 = vtanh.f32 %v978_v7 }
 0x20f   : > { %v983_v10 = vmul.f32 %v981_v8, %v829_v9 }
 0x211   : > { %v985_v13 = vadd.f32 %v983_v10, %v1861_v0 }
 0x213   : > { %987 = vst [vmem:[%s336_s16] sm:$0xff] %v985_v13 }
 0x214   : > { %v1529_v16 = vpop.eup %1528 }
 0x215   : > { %v982_v19 = vsub.f32 %v1529_v16, %v1863_v1 }
 0x217   : > { %v984_v0 = vmul.f32 %v982_v19, %v844_v20 }
 0x219   : > { %v986_v21 = vadd.f32 %v984_v0, %v1863_v1 }
 0x21b   : > { %988 = vst [vmem:[%s336_s16 + $0x8] sm:$0xff] %v986_v21 }
 0x21c   : > { %1647 = shalt.err (!%p1644_p12)
}
 0x21d   : > { %s1699_s11 = smov 128   ;;  %s1700_s18 = smov 8  }
 0x21e   : > { %1445 = dma.vmem_to_hbm [thread:$0]  (%p1808_p5), %s1003_s25, 256, %s1005_s17, %s990_s26, %s1699_s11, %s1699_s11, %s1700_s18  }
 0x21f PF: > { %s1019_s19 = sand.u32 1, %s1678_s21   ;;  %p1946_p13 = scmp.ge.s32.totalorder %s1690_s24, 2 }
 0x220   : > { %s1020_s10 = scalar_lea.sflag [#allocation4], %s1019_s19 }
 0x221   : > { %p1459_p0 = pnand %p1946_p13, %p1771_p6 }
 0x223   : > { %p1460_p3 = pneg %p1459_p0 }
 0x225   : > { %1673 = dma.done.wait (%p1460_p3), %s1020_s10, 256  }
 0x226   : > { %1675 = vsyncadd (%p1460_p3), %s1020_s10, 4294967040  ;;  %p20_p7 = scmp.ge.s32.totalorder %s1795_s20, 4   ;;  %s1947_s21 = smov %s1682_s22 }
 0x227   : > { %s1948_s22 = smov %s1686_s23  ;;  %s1949_s23 = smov %s1804_s30 }
 0x228   : > { %s1950_s24 = smov %s1795_s20  ;;  %22 = sbr.rel (!%p20_p7) target bundleno = 6 (0x6), region = 103 }
 0x22d   :  { %1026 = vsyncpa [#allocation3], 1 }
 0x22e   :  { %1028 = vsyncpa [#allocation3 + $0x1], 1 }
 0x22f   :  { %1029 = vsyncpa [#allocation6], 1 }
 0x230   :  { %1030 = vsyncpa [#allocation4], 1 }
 0x231   :  { %1032 = vsyncpa [#allocation4 + $0x1], 1 }

</bundles_post_ra>
